<compile_context>
chip_gen: v7x
topology: tpu7x:2x2x1
jax: 0.10.0
libtpu: 0.0.40
codegen_flags: <defaults>
</compile_context>

<pallas_src>
import numpy as np
import jax
import jax.numpy as jnp
from jax.experimental import pallas as pl
from jax.experimental.pallas import tpu as pltpu


# ----------------------------------------------------------------------------
# Parameter construction (glue, runs once at init)
# ----------------------------------------------------------------------------
def make_hand_mapper_np():
    """Numpy port of makeHandMapper(): returns (2, 20, 72, 72) float32."""
    base = np.zeros((20, 72, 72), dtype=np.float32)
    base[0, :15, :15] = np.eye(15, dtype=np.float32)
    eye3 = np.eye(3, dtype=np.float32)
    for fi in range(5):
        fi_idx = 4 - fi
        if fi == 0:
            row_start, row_end = 15 + 12 * fi_idx, 72
            col_start = 15 + 12 * fi_idx
            base[0, 15 + 12 * fi_idx:, :3] = np.concatenate([eye3] * 3, axis=0)
            base[fi + 1, row_start:row_end, col_start:col_start + 3] = np.concatenate([eye3] * 3, axis=0)
            base[3 * (fi_idx + 2), row_start + 3:row_end, col_start + 3:col_start + 6] = np.concatenate([eye3] * 2, axis=0)
            base[3 * (fi_idx + 2) + 1, row_start + 6:row_end, col_start + 6:col_start + 9] = eye3
        else:
            row_start, row_end = 15 + 12 * fi_idx, 15 + 12 * (fi_idx + 1)
            col_start = 15 + 12 * fi_idx
            base[0, row_start:row_end, 3 * fi:3 * (fi + 1)] = np.concatenate([eye3] * 4, axis=0)
            base[fi + 1, row_start:row_end, col_start:col_start + 3] = np.concatenate([eye3] * 4, axis=0)
            base[3 * (fi_idx + 2), row_start + 3:row_end, col_start + 3:col_start + 6] = np.concatenate([eye3] * 3, axis=0)
            base[3 * (fi_idx + 2) + 1, row_start + 6:row_end, col_start + 6:col_start + 9] = np.concatenate([eye3] * 2, axis=0)
            base[3 * (fi_idx + 2) + 2, row_start + 9:row_end, col_start + 9:col_start + 12] = eye3
    return np.stack([base, base], axis=0)  # (2, 20, 72, 72)


def make_handmaker_mapper(bone_length):
    """HandMaker.__init__: bone_length (2, 72) -> mapper (2, 20, 24, 3) (frozen nn.Parameter)."""
    hand_mapper = jnp.asarray(make_hand_mapper_np())                 # (2,20,72,72)
    mapped = jnp.einsum('sjmk,sk->sjm', hand_mapper, bone_length)    # (2,20,72)
    return mapped.reshape(2, 20, 24, 3).astype(jnp.float32)


def init_hand_maker(bone_length):
    """Build mapper + the kernel weight layout ONCE (hoisted out of forward)."""
    mapper = make_handmaker_mapper(bone_length)                      # (2,20,24,3) [s, r, j, k]
    w = jnp.transpose(mapper, (0, 3, 1, 2))                          # (2,3,20,24) [s, k, r, j]
    # pad bone 20->24 (zero rows), prepend an all-zero joint 0 (wrist) -> wrist concat folded in
    w = jnp.pad(w, ((0, 0), (0, 0), (0, 4), (1, 0)))                 # (2,3,24,25)
    w = jnp.transpose(w, (0, 1, 3, 2))                               # (2,3,25,24) [s, k, j, r]
    return mapper, w.astype(jnp.float32)


def _round_up(x, m):
    return (x + m - 1) // m * m


# ----------------------------------------------------------------------------
# Pallas kernel: strip-mined 6D->matrix (rsqrt on EUP) + interleaved MXU dots
# ----------------------------------------------------------------------------
_STRIP = 128   # frame strip inside a tile (one lane-tile); caps vreg working set


def hand_maker_kernel(orient_ref, w_ref, out_ref):
    # orient_ref : (2, 6, 24, TF)  [hand, 6d-component, bone(pad 20->24), frame]  lane-dense frames
    # w_ref      : (2, 3, 25, 24)  [hand, xyz-component, joint(0 = wrist, zeros), bone]
    # out_ref    : (2, 3, 25, TF)  [hand, matrix-row, joint, frame]
    eps2 = jnp.float32(1e-24)
    tf = orient_ref.shape[-1]
    ts = _STRIP
    n_strips = tf // ts

    @pl.loop(0, n_strips)                              # rolled loop -> bounded live ranges, no spills
    def _(t):
        f0 = pl.multiple_of(t * ts, ts)
        fsl = pl.ds(f0, ts)
        for s in range(2):                             # hand (static unroll)
            wx = w_ref[s, 0]                           # (25, 24) tiny weight tiles
            wy = w_ref[s, 1]
            wz = w_ref[s, 2]

            a1x = orient_ref[s, 0, :, fsl]             # each (24, ts)
            a1y = orient_ref[s, 1, :, fsl]
            a1z = orient_ref[s, 2, :, fsl]

            # b1 = normalize(a1)   (rsqrt(max(.,eps)) == torch F.normalize eps=1e-12; keeps pads at 0)
            inv1 = jax.lax.rsqrt(jnp.maximum(a1x * a1x + a1y * a1y + a1z * a1z, eps2))
            b1x, b1y, b1z = a1x * inv1, a1y * inv1, a1z * inv1
            # row 0 matmul issued immediately: 3 accumulating K=24 dots (no materialized concat)
            out_ref[s, 0, :, fsl] = (
                jnp.dot(wx, b1x, preferred_element_type=jnp.float32)
                + jnp.dot(wy, b1y, preferred_element_type=jnp.float32)
                + jnp.dot(wz, b1z, preferred_element_type=jnp.float32))

            a2x = orient_ref[s, 3, :, fsl]
            a2y = orient_ref[s, 4, :, fsl]
            a2z = orient_ref[s, 5, :, fsl]

            # b2 = normalize(a2 - <b1,a2> b1)
            d = b1x * a2x + b1y * a2y + b1z * a2z
            u2x, u2y, u2z = a2x - d * b1x, a2y - d * b1y, a2z - d * b1z
            inv2 = jax.lax.rsqrt(jnp.maximum(u2x * u2x + u2y * u2y + u2z * u2z, eps2))
            b2x, b2y, b2z = u2x * inv2, u2y * inv2, u2z * inv2
            out_ref[s, 1, :, fsl] = (
                jnp.dot(wx, b2x, preferred_element_type=jnp.float32)
                + jnp.dot(wy, b2y, preferred_element_type=jnp.float32)
                + jnp.dot(wz, b2z, preferred_element_type=jnp.float32))

            # b3 = b1 x b2
            b3x = b1y * b2z - b1z * b2y
            b3y = b1z * b2x - b1x * b2z
            b3z = b1x * b2y - b1y * b2x
            out_ref[s, 2, :, fsl] = (
                jnp.dot(wx, b3x, preferred_element_type=jnp.float32)
                + jnp.dot(wy, b3y, preferred_element_type=jnp.float32)
                + jnp.dot(wz, b3z, preferred_element_type=jnp.float32))


def hand_maker_forward(orientation, w, *, tf_max=2048):
    """orientation: (F, 40, 6) f32, w: (2, 3, 25, 24) f32 (from init) -> (F, 2, 25, 3) f32."""
    F = orientation.shape[0]
    orientation = orientation.astype(jnp.float32)

    # Frame tile: large enough to amortize the ~0.35us/grid-step overhead, multiple of 128,
    # capped so the "parallel" frame axis gets >=2 steps when F allows (v7x megacore).
    Fp0 = _round_up(max(F, 1), 128)
    half = _round_up((Fp0 + 1) // 2, 128)
    tf = max(128, min(int(tf_max), half))
    Fp = _round_up(max(F, 1), tf)

    # TODO(synk): in an end-to-end model, have the producer emit orientation already in
    # frame-minor (2,6,20,F) layout and let the consumer accept (2,3,25,F); these wrapper
    # relayouts are extra full HBM passes comparable to the kernel's own traffic.
    o = orientation.reshape(F, 2, 20, 6)                        # joint = hand*20 + bone
    o = jnp.transpose(o, (1, 3, 2, 0))                          # (2, 6, 20, F)
    o = jnp.pad(o, ((0, 0), (0, 0), (0, 4), (0, Fp - F)))       # (2, 6, 24, Fp)  zero pads

    cost = pl.CostEstimate(
        flops=int(Fp) * 23800,                                  # 18 K=24 dots + elementwise, per frame
        transcendentals=int(Fp) * 96,                           # 2 rsqrt per (hand, bone_pad)
        bytes_accessed=int(Fp) * (2 * 6 * 24 * 4 + 2 * 3 * 25 * 4) + int(w.size) * 4)

    out_flat = pl.pallas_call(
        hand_maker_kernel,
        out_shape=jax.ShapeDtypeStruct((2, 3, 25, Fp), jnp.float32),
        grid_spec=pltpu.PrefetchScalarGridSpec(
            num_scalar_prefetch=0,
            grid=(Fp // tf,),
            in_specs=[
                pl.BlockSpec((2, 6, 24, tf), lambda i: (0, 0, 0, i)),
                pl.BlockSpec((2, 3, 25, 24), lambda i: (0, 0, 0, 0)),
            ],
            out_specs=pl.BlockSpec((2, 3, 25, tf), lambda i: (0, 0, 0, i)),
        ),
        compiler_params=pltpu.CompilerParams(
            dimension_semantics=("parallel",),
            vmem_limit_bytes=32 * 1024 * 1024),
        cost_estimate=cost,
    )(o, w)

    # Wrist is already joint 0 (all-zero weight row) -> no concat; just un-pad + relayout.
    return jnp.transpose(out_flat[:, :, :, :F], (3, 0, 2, 1))   # (F, 2, 25, 3)


# ----------------------------------------------------------------------------
# Pure-JAX reference (for correctness check)
# ----------------------------------------------------------------------------
def reference_forward(orientation, mapper):
    a1, a2 = orientation[..., :3], orientation[..., 3:]

    def _norm(v):
        return v / jnp.maximum(jnp.linalg.norm(v, axis=-1, keepdims=True), 1e-12)

    b1 = _norm(a1)
    b2 = _norm(a2 - jnp.sum(b1 * a2, axis=-1, keepdims=True) * b1)
    b3 = jnp.cross(b1, b2)
    mat = jnp.stack([b1, b2, b3], axis=-2)                      # (F, 40, 3, 3)
    F = orientation.shape[0]
    mat = mat.reshape(F, 2, 20, 3, 3)
    rel = jnp.einsum('fsrmk,srjk->fsrjm', mat, mapper)
    acq = jnp.sum(rel, axis=2)                                  # (F, 2, 24, 3)
    wrist = jnp.zeros((F, 2, 1, 3), jnp.float32)
    return jnp.concatenate([wrist, acq], axis=2)                # (F, 2, 25, 3)


if __name__ == "__main__":
    key = jax.random.PRNGKey(0)
    k_bone, k_small, k_big = jax.random.split(key, 3)

    # Deterministic synthetic parameters / inputs.
    bone_length = jax.random.normal(k_bone, (2, 72), dtype=jnp.float32)
    mapper, w = init_hand_maker(bone_length)            # mapper (2,20,24,3); w is the kernel layout

    fwd = jax.jit(hand_maker_forward)

    # Small-F check (single grid step), matching the module's expected small shapes.
    o_small = jax.random.normal(k_small, (8, 40, 6), dtype=jnp.float32)     # F=8 frames
    out_small = jax.block_until_ready(fwd(o_small, w))
    assert out_small.shape == (8, 2, 25, 3)
    ref_small = jax.block_until_ready(reference_forward(o_small, mapper))
    np.testing.assert_allclose(np.asarray(out_small), np.asarray(ref_small),
                               rtol=1e-4, atol=1e-4)

    # Larger-F check: exercises frame padding, the multi-step grid and megacore sharding.
    o_big = jax.random.normal(k_big, (2500, 40, 6), dtype=jnp.float32)
    out_big = jax.block_until_ready(fwd(o_big, w))
    assert out_big.shape == (2500, 2, 25, 3)
    ref_big = jax.block_until_ready(reference_forward(o_big, mapper))
    np.testing.assert_allclose(np.asarray(out_big), np.asarray(ref_big),
                               rtol=1e-4, atol=1e-4)

    print("KERNEL_OK")
</pallas_src>

<mosaic_0001>
module attributes {stable_mosaic.version = 11 : i64} {
  func.func @hand_maker_kernel(%arg0: i32, %arg1: memref<2x6x24x128xf32, #tpu.memory_space<vmem>>, %arg2: memref<2x3x25x24xf32, #tpu.memory_space<vmem>>, %arg3: memref<2x3x25x128xf32, #tpu.memory_space<vmem>>) attributes {dimension_semantics = [#tpu.dimension_semantics<parallel>], iteration_bounds = array<i64: 1>, scalar_prefetch = 0 : i64, scratch_operands = 0 : i64, tpu.core_type = #tpu.core_type<tc>, window_params = [{transform_indices = @transform_0, window_bounds = array<i64: 2, 6, 24, 128>}, {pipeline_mode = #tpu.pipeline_mode<synchronous>, transform_indices = @transform_1, window_bounds = array<i64: 2, 3, 25, 24>}, {transform_indices = @transform_2, window_bounds = array<i64: 2, 3, 25, 128>}]} {
    %cst = arith.constant 1.000000e-24 : f32
    %c0_i32 = arith.constant 0 : i32
    %c1_i32 = arith.constant 1 : i32
    %0 = arith.muli %c0_i32, %c1_i32 : i32
    %c0_i32_0 = arith.constant 0 : i32
    %1 = arith.addi %c0_i32_0, %0 : i32
    %c128_i32 = arith.constant 128 : i32
    %2 = arith.muli %1, %c128_i32 : i32
    %3 = tpu.assume_multiple %2, 128 : i32
    %c0 = arith.constant 0 : index
    %c0_1 = arith.constant 0 : index
    %c0_2 = arith.constant 0 : index
    %c0_3 = arith.constant 0 : index
    %4 = vector.load %arg2[%c0, %c0_1, %c0_2, %c0_3] : memref<2x3x25x24xf32, #tpu.memory_space<vmem>>, vector<1x1x25x24xf32>
    %5 = vector.shape_cast %4 : vector<1x1x25x24xf32> to vector<25x24xf32>
    %c0_4 = arith.constant 0 : index
    %c1 = arith.constant 1 : index
    %c0_5 = arith.constant 0 : index
    %c0_6 = arith.constant 0 : index
    %6 = vector.load %arg2[%c0_4, %c1, %c0_5, %c0_6] : memref<2x3x25x24xf32, #tpu.memory_space<vmem>>, vector<1x1x25x24xf32>
    %7 = vector.shape_cast %6 : vector<1x1x25x24xf32> to vector<25x24xf32>
    %c0_7 = arith.constant 0 : index
    %c2 = arith.constant 2 : index
    %c0_8 = arith.constant 0 : index
    %c0_9 = arith.constant 0 : index
    %8 = vector.load %arg2[%c0_7, %c2, %c0_8, %c0_9] : memref<2x3x25x24xf32, #tpu.memory_space<vmem>>, vector<1x1x25x24xf32>
    %9 = vector.shape_cast %8 : vector<1x1x25x24xf32> to vector<25x24xf32>
    %c0_10 = arith.constant 0 : index
    %c0_11 = arith.constant 0 : index
    %c0_12 = arith.constant 0 : index
    %10 = arith.index_cast %3 : i32 to index
    %11 = vector.load %arg1[%c0_10, %c0_11, %c0_12, %10] : memref<2x6x24x128xf32, #tpu.memory_space<vmem>>, vector<1x1x24x128xf32>
    %12 = vector.shape_cast %11 : vector<1x1x24x128xf32> to vector<24x128xf32>
    %c0_13 = arith.constant 0 : index
    %c1_14 = arith.constant 1 : index
    %c0_15 = arith.constant 0 : index
    %13 = arith.index_cast %3 : i32 to index
    %14 = vector.load %arg1[%c0_13, %c1_14, %c0_15, %13] : memref<2x6x24x128xf32, #tpu.memory_space<vmem>>, vector<1x1x24x128xf32>
    %15 = vector.shape_cast %14 : vector<1x1x24x128xf32> to vector<24x128xf32>
    %c0_16 = arith.constant 0 : index
    %c2_17 = arith.constant 2 : index
    %c0_18 = arith.constant 0 : index
    %16 = arith.index_cast %3 : i32 to index
    %17 = vector.load %arg1[%c0_16, %c2_17, %c0_18, %16] : memref<2x6x24x128xf32, #tpu.memory_space<vmem>>, vector<1x1x24x128xf32>
    %18 = vector.shape_cast %17 : vector<1x1x24x128xf32> to vector<24x128xf32>
    %19 = arith.mulf %12, %12 : vector<24x128xf32>
    %20 = arith.mulf %15, %15 : vector<24x128xf32>
    %21 = arith.addf %19, %20 : vector<24x128xf32>
    %22 = arith.mulf %18, %18 : vector<24x128xf32>
    %23 = arith.addf %21, %22 : vector<24x128xf32>
    %24 = vector.broadcast %cst : f32 to vector<24x128xf32>
    %25 = arith.maximumf %23, %24 : vector<24x128xf32>
    %26 = math.rsqrt %25 : vector<24x128xf32>
    %27 = arith.mulf %12, %26 : vector<24x128xf32>
    %28 = arith.mulf %15, %26 : vector<24x128xf32>
    %29 = arith.mulf %18, %26 : vector<24x128xf32>
    %cst_19 = arith.constant dense<0.000000e+00> : vector<25x128xf32>
    %30 = tpu.matmul %5, %27, %cst_19 {dimension_numbers = #tpu.dot_dimension_numbers<[1], [0], [0], [1], [0, 0, 1, 1], [], []>} : vector<25x24xf32>, vector<24x128xf32>, vector<25x128xf32> -> vector<25x128xf32>
    %cst_20 = arith.constant dense<0.000000e+00> : vector<25x128xf32>
    %31 = tpu.matmul %7, %28, %cst_20 {dimension_numbers = #tpu.dot_dimension_numbers<[1], [0], [0], [1], [0, 0, 1, 1], [], []>} : vector<25x24xf32>, vector<24x128xf32>, vector<25x128xf32> -> vector<25x128xf32>
    %32 = arith.addf %30, %31 : vector<25x128xf32>
    %cst_21 = arith.constant dense<0.000000e+00> : vector<25x128xf32>
    %33 = tpu.matmul %9, %29, %cst_21 {dimension_numbers = #tpu.dot_dimension_numbers<[1], [0], [0], [1], [0, 0, 1, 1], [], []>} : vector<25x24xf32>, vector<24x128xf32>, vector<25x128xf32> -> vector<25x128xf32>
    %34 = arith.addf %32, %33 : vector<25x128xf32>
    %c0_22 = arith.constant 0 : index
    %c0_23 = arith.constant 0 : index
    %c0_24 = arith.constant 0 : index
    %35 = arith.index_cast %3 : i32 to index
    %36 = vector.load %arg3[%c0_22, %c0_23, %c0_24, %35] : memref<2x3x25x128xf32, #tpu.memory_space<vmem>>, vector<1x1x25x128xf32>
    %37 = vector.shape_cast %36 : vector<1x1x25x128xf32> to vector<25x128xf32>
    %38 = vector.shape_cast %34 : vector<25x128xf32> to vector<1x1x25x128xf32>
    tpu.vector_store %arg3[%c0_22, %c0_23, %c0_24, %35], %38 {strides = array<i32>} : memref<2x3x25x128xf32, #tpu.memory_space<vmem>>, vector<1x1x25x128xf32>,
    %c0_25 = arith.constant 0 : index
    %c3 = arith.constant 3 : index
    %c0_26 = arith.constant 0 : index
    %39 = arith.index_cast %3 : i32 to index
    %40 = vector.load %arg1[%c0_25, %c3, %c0_26, %39] : memref<2x6x24x128xf32, #tpu.memory_space<vmem>>, vector<1x1x24x128xf32>
    %41 = vector.shape_cast %40 : vector<1x1x24x128xf32> to vector<24x128xf32>
    %c0_27 = arith.constant 0 : index
    %c4 = arith.constant 4 : index
    %c0_28 = arith.constant 0 : index
    %42 = arith.index_cast %3 : i32 to index
    %43 = vector.load %arg1[%c0_27, %c4, %c0_28, %42] : memref<2x6x24x128xf32, #tpu.memory_space<vmem>>, vector<1x1x24x128xf32>
    %44 = vector.shape_cast %43 : vector<1x1x24x128xf32> to vector<24x128xf32>
    %c0_29 = arith.constant 0 : index
    %c5 = arith.constant 5 : index
    %c0_30 = arith.constant 0 : index
    %45 = arith.index_cast %3 : i32 to index
    %46 = vector.load %arg1[%c0_29, %c5, %c0_30, %45] : memref<2x6x24x128xf32, #tpu.memory_space<vmem>>, vector<1x1x24x128xf32>
    %47 = vector.shape_cast %46 : vector<1x1x24x128xf32> to vector<24x128xf32>
    %48 = arith.mulf %27, %41 : vector<24x128xf32>
    %49 = arith.mulf %28, %44 : vector<24x128xf32>
    %50 = arith.addf %48, %49 : vector<24x128xf32>
    %51 = arith.mulf %29, %47 : vector<24x128xf32>
    %52 = arith.addf %50, %51 : vector<24x128xf32>
    %53 = arith.mulf %52, %27 : vector<24x128xf32>
    %54 = arith.subf %41, %53 : vector<24x128xf32>
    %55 = arith.mulf %52, %28 : vector<24x128xf32>
    %56 = arith.subf %44, %55 : vector<24x128xf32>
    %57 = arith.mulf %52, %29 : vector<24x128xf32>
    %58 = arith.subf %47, %57 : vector<24x128xf32>
    %59 = arith.mulf %54, %54 : vector<24x128xf32>
    %60 = arith.mulf %56, %56 : vector<24x128xf32>
    %61 = arith.addf %59, %60 : vector<24x128xf32>
    %62 = arith.mulf %58, %58 : vector<24x128xf32>
    %63 = arith.addf %61, %62 : vector<24x128xf32>
    %64 = vector.broadcast %cst : f32 to vector<24x128xf32>
    %65 = arith.maximumf %63, %64 : vector<24x128xf32>
    %66 = math.rsqrt %65 : vector<24x128xf32>
    %67 = arith.mulf %54, %66 : vector<24x128xf32>
    %68 = arith.mulf %56, %66 : vector<24x128xf32>
    %69 = arith.mulf %58, %66 : vector<24x128xf32>
    %cst_31 = arith.constant dense<0.000000e+00> : vector<25x128xf32>
    %70 = tpu.matmul %5, %67, %cst_31 {dimension_numbers = #tpu.dot_dimension_numbers<[1], [0], [0], [1], [0, 0, 1, 1], [], []>} : vector<25x24xf32>, vector<24x128xf32>, vector<25x128xf32> -> vector<25x128xf32>
    %cst_32 = arith.constant dense<0.000000e+00> : vector<25x128xf32>
    %71 = tpu.matmul %7, %68, %cst_32 {dimension_numbers = #tpu.dot_dimension_numbers<[1], [0], [0], [1], [0, 0, 1, 1], [], []>} : vector<25x24xf32>, vector<24x128xf32>, vector<25x128xf32> -> vector<25x128xf32>
    %72 = arith.addf %70, %71 : vector<25x128xf32>
    %cst_33 = arith.constant dense<0.000000e+00> : vector<25x128xf32>
    %73 = tpu.matmul %9, %69, %cst_33 {dimension_numbers = #tpu.dot_dimension_numbers<[1], [0], [0], [1], [0, 0, 1, 1], [], []>} : vector<25x24xf32>, vector<24x128xf32>, vector<25x128xf32> -> vector<25x128xf32>
    %74 = arith.addf %72, %73 : vector<25x128xf32>
    %c0_34 = arith.constant 0 : index
    %c1_35 = arith.constant 1 : index
    %c0_36 = arith.constant 0 : index
    %75 = arith.index_cast %3 : i32 to index
    %76 = vector.load %arg3[%c0_34, %c1_35, %c0_36, %75] : memref<2x3x25x128xf32, #tpu.memory_space<vmem>>, vector<1x1x25x128xf32>
    %77 = vector.shape_cast %76 : vector<1x1x25x128xf32> to vector<25x128xf32>
    %78 = vector.shape_cast %74 : vector<25x128xf32> to vector<1x1x25x128xf32>
    tpu.vector_store %arg3[%c0_34, %c1_35, %c0_36, %75], %78 {strides = array<i32>} : memref<2x3x25x128xf32, #tpu.memory_space<vmem>>, vector<1x1x25x128xf32>,
    %79 = arith.mulf %28, %69 : vector<24x128xf32>
    %80 = arith.mulf %29, %68 : vector<24x128xf32>
    %81 = arith.subf %79, %80 : vector<24x128xf32>
    %82 = arith.mulf %29, %67 : vector<24x128xf32>
    %83 = arith.mulf %27, %69 : vector<24x128xf32>
    %84 = arith.subf %82, %83 : vector<24x128xf32>
    %85 = arith.mulf %27, %68 : vector<24x128xf32>
    %86 = arith.mulf %28, %67 : vector<24x128xf32>
    %87 = arith.subf %85, %86 : vector<24x128xf32>
    %cst_37 = arith.constant dense<0.000000e+00> : vector<25x128xf32>
    %88 = tpu.matmul %5, %81, %cst_37 {dimension_numbers = #tpu.dot_dimension_numbers<[1], [0], [0], [1], [0, 0, 1, 1], [], []>} : vector<25x24xf32>, vector<24x128xf32>, vector<25x128xf32> -> vector<25x128xf32>
    %cst_38 = arith.constant dense<0.000000e+00> : vector<25x128xf32>
    %89 = tpu.matmul %7, %84, %cst_38 {dimension_numbers = #tpu.dot_dimension_numbers<[1], [0], [0], [1], [0, 0, 1, 1], [], []>} : vector<25x24xf32>, vector<24x128xf32>, vector<25x128xf32> -> vector<25x128xf32>
    %90 = arith.addf %88, %89 : vector<25x128xf32>
    %cst_39 = arith.constant dense<0.000000e+00> : vector<25x128xf32>
    %91 = tpu.matmul %9, %87, %cst_39 {dimension_numbers = #tpu.dot_dimension_numbers<[1], [0], [0], [1], [0, 0, 1, 1], [], []>} : vector<25x24xf32>, vector<24x128xf32>, vector<25x128xf32> -> vector<25x128xf32>
    %92 = arith.addf %90, %91 : vector<25x128xf32>
    %c0_40 = arith.constant 0 : index
    %c2_41 = arith.constant 2 : index
    %c0_42 = arith.constant 0 : index
    %93 = arith.index_cast %3 : i32 to index
    %94 = vector.load %arg3[%c0_40, %c2_41, %c0_42, %93] : memref<2x3x25x128xf32, #tpu.memory_space<vmem>>, vector<1x1x25x128xf32>
    %95 = vector.shape_cast %94 : vector<1x1x25x128xf32> to vector<25x128xf32>
    %96 = vector.shape_cast %92 : vector<25x128xf32> to vector<1x1x25x128xf32>
    tpu.vector_store %arg3[%c0_40, %c2_41, %c0_42, %93], %96 {strides = array<i32>} : memref<2x3x25x128xf32, #tpu.memory_space<vmem>>, vector<1x1x25x128xf32>,
    %c1_43 = arith.constant 1 : index
    %c0_44 = arith.constant 0 : index
    %c0_45 = arith.constant 0 : index
    %c0_46 = arith.constant 0 : index
    %97 = vector.load %arg2[%c1_43, %c0_44, %c0_45, %c0_46] : memref<2x3x25x24xf32, #tpu.memory_space<vmem>>, vector<1x1x25x24xf32>
    %98 = vector.shape_cast %97 : vector<1x1x25x24xf32> to vector<25x24xf32>
    %c1_47 = arith.constant 1 : index
    %c1_48 = arith.constant 1 : index
    %c0_49 = arith.constant 0 : index
    %c0_50 = arith.constant 0 : index
    %99 = vector.load %arg2[%c1_47, %c1_48, %c0_49, %c0_50] : memref<2x3x25x24xf32, #tpu.memory_space<vmem>>, vector<1x1x25x24xf32>
    %100 = vector.shape_cast %99 : vector<1x1x25x24xf32> to vector<25x24xf32>
    %c1_51 = arith.constant 1 : index
    %c2_52 = arith.constant 2 : index
    %c0_53 = arith.constant 0 : index
    %c0_54 = arith.constant 0 : index
    %101 = vector.load %arg2[%c1_51, %c2_52, %c0_53, %c0_54] : memref<2x3x25x24xf32, #tpu.memory_space<vmem>>, vector<1x1x25x24xf32>
    %102 = vector.shape_cast %101 : vector<1x1x25x24xf32> to vector<25x24xf32>
    %c1_55 = arith.constant 1 : index
    %c0_56 = arith.constant 0 : index
    %c0_57 = arith.constant 0 : index
    %103 = arith.index_cast %3 : i32 to index
    %104 = vector.load %arg1[%c1_55, %c0_56, %c0_57, %103] : memref<2x6x24x128xf32, #tpu.memory_space<vmem>>, vector<1x1x24x128xf32>
    %105 = vector.shape_cast %104 : vector<1x1x24x128xf32> to vector<24x128xf32>
    %c1_58 = arith.constant 1 : index
    %c1_59 = arith.constant 1 : index
    %c0_60 = arith.constant 0 : index
    %106 = arith.index_cast %3 : i32 to index
    %107 = vector.load %arg1[%c1_58, %c1_59, %c0_60, %106] : memref<2x6x24x128xf32, #tpu.memory_space<vmem>>, vector<1x1x24x128xf32>
    %108 = vector.shape_cast %107 : vector<1x1x24x128xf32> to vector<24x128xf32>
    %c1_61 = arith.constant 1 : index
    %c2_62 = arith.constant 2 : index
    %c0_63 = arith.constant 0 : index
    %109 = arith.index_cast %3 : i32 to index
    %110 = vector.load %arg1[%c1_61, %c2_62, %c0_63, %109] : memref<2x6x24x128xf32, #tpu.memory_space<vmem>>, vector<1x1x24x128xf32>
    %111 = vector.shape_cast %110 : vector<1x1x24x128xf32> to vector<24x128xf32>
    %112 = arith.mulf %105, %105 : vector<24x128xf32>
    %113 = arith.mulf %108, %108 : vector<24x128xf32>
    %114 = arith.addf %112, %113 : vector<24x128xf32>
    %115 = arith.mulf %111, %111 : vector<24x128xf32>
    %116 = arith.addf %114, %115 : vector<24x128xf32>
    %117 = vector.broadcast %cst : f32 to vector<24x128xf32>
    %118 = arith.maximumf %116, %117 : vector<24x128xf32>
    %119 = math.rsqrt %118 : vector<24x128xf32>
    %120 = arith.mulf %105, %119 : vector<24x128xf32>
    %121 = arith.mulf %108, %119 : vector<24x128xf32>
    %122 = arith.mulf %111, %119 : vector<24x128xf32>
    %cst_64 = arith.constant dense<0.000000e+00> : vector<25x128xf32>
    %123 = tpu.matmul %98, %120, %cst_64 {dimension_numbers = #tpu.dot_dimension_numbers<[1], [0], [0], [1], [0, 0, 1, 1], [], []>} : vector<25x24xf32>, vector<24x128xf32>, vector<25x128xf32> -> vector<25x128xf32>
    %cst_65 = arith.constant dense<0.000000e+00> : vector<25x128xf32>
    %124 = tpu.matmul %100, %121, %cst_65 {dimension_numbers = #tpu.dot_dimension_numbers<[1], [0], [0], [1], [0, 0, 1, 1], [], []>} : vector<25x24xf32>, vector<24x128xf32>, vector<25x128xf32> -> vector<25x128xf32>
    %125 = arith.addf %123, %124 : vector<25x128xf32>
    %cst_66 = arith.constant dense<0.000000e+00> : vector<25x128xf32>
    %126 = tpu.matmul %102, %122, %cst_66 {dimension_numbers = #tpu.dot_dimension_numbers<[1], [0], [0], [1], [0, 0, 1, 1], [], []>} : vector<25x24xf32>, vector<24x128xf32>, vector<25x128xf32> -> vector<25x128xf32>
    %127 = arith.addf %125, %126 : vector<25x128xf32>
    %c1_67 = arith.constant 1 : index
    %c0_68 = arith.constant 0 : index
    %c0_69 = arith.constant 0 : index
    %128 = arith.index_cast %3 : i32 to index
    %129 = vector.load %arg3[%c1_67, %c0_68, %c0_69, %128] : memref<2x3x25x128xf32, #tpu.memory_space<vmem>>, vector<1x1x25x128xf32>
    %130 = vector.shape_cast %129 : vector<1x1x25x128xf32> to vector<25x128xf32>
    %131 = vector.shape_cast %127 : vector<25x128xf32> to vector<1x1x25x128xf32>
    tpu.vector_store %arg3[%c1_67, %c0_68, %c0_69, %128], %131 {strides = array<i32>} : memref<2x3x25x128xf32, #tpu.memory_space<vmem>>, vector<1x1x25x128xf32>,
    %c1_70 = arith.constant 1 : index
    %c3_71 = arith.constant 3 : index
    %c0_72 = arith.constant 0 : index
    %132 = arith.index_cast %3 : i32 to index
    %133 = vector.load %arg1[%c1_70, %c3_71, %c0_72, %132] : memref<2x6x24x128xf32, #tpu.memory_space<vmem>>, vector<1x1x24x128xf32>
    %134 = vector.shape_cast %133 : vector<1x1x24x128xf32> to vector<24x128xf32>
    %c1_73 = arith.constant 1 : index
    %c4_74 = arith.constant 4 : index
    %c0_75 = arith.constant 0 : index
    %135 = arith.index_cast %3 : i32 to index
    %136 = vector.load %arg1[%c1_73, %c4_74, %c0_75, %135] : memref<2x6x24x128xf32, #tpu.memory_space<vmem>>, vector<1x1x24x128xf32>
    %137 = vector.shape_cast %136 : vector<1x1x24x128xf32> to vector<24x128xf32>
    %c1_76 = arith.constant 1 : index
    %c5_77 = arith.constant 5 : index
    %c0_78 = arith.constant 0 : index
    %138 = arith.index_cast %3 : i32 to index
    %139 = vector.load %arg1[%c1_76, %c5_77, %c0_78, %138] : memref<2x6x24x128xf32, #tpu.memory_space<vmem>>, vector<1x1x24x128xf32>
    %140 = vector.shape_cast %139 : vector<1x1x24x128xf32> to vector<24x128xf32>
    %141 = arith.mulf %120, %134 : vector<24x128xf32>
    %142 = arith.mulf %121, %137 : vector<24x128xf32>
    %143 = arith.addf %141, %142 : vector<24x128xf32>
    %144 = arith.mulf %122, %140 : vector<24x128xf32>
    %145 = arith.addf %143, %144 : vector<24x128xf32>
    %146 = arith.mulf %145, %120 : vector<24x128xf32>
    %147 = arith.subf %134, %146 : vector<24x128xf32>
    %148 = arith.mulf %145, %121 : vector<24x128xf32>
    %149 = arith.subf %137, %148 : vector<24x128xf32>
    %150 = arith.mulf %145, %122 : vector<24x128xf32>
    %151 = arith.subf %140, %150 : vector<24x128xf32>
    %152 = arith.mulf %147, %147 : vector<24x128xf32>
    %153 = arith.mulf %149, %149 : vector<24x128xf32>
    %154 = arith.addf %152, %153 : vector<24x128xf32>
    %155 = arith.mulf %151, %151 : vector<24x128xf32>
    %156 = arith.addf %154, %155 : vector<24x128xf32>
    %157 = vector.broadcast %cst : f32 to vector<24x128xf32>
    %158 = arith.maximumf %156, %157 : vector<24x128xf32>
    %159 = math.rsqrt %158 : vector<24x128xf32>
    %160 = arith.mulf %147, %159 : vector<24x128xf32>
    %161 = arith.mulf %149, %159 : vector<24x128xf32>
    %162 = arith.mulf %151, %159 : vector<24x128xf32>
    %cst_79 = arith.constant dense<0.000000e+00> : vector<25x128xf32>
    %163 = tpu.matmul %98, %160, %cst_79 {dimension_numbers = #tpu.dot_dimension_numbers<[1], [0], [0], [1], [0, 0, 1, 1], [], []>} : vector<25x24xf32>, vector<24x128xf32>, vector<25x128xf32> -> vector<25x128xf32>
    %cst_80 = arith.constant dense<0.000000e+00> : vector<25x128xf32>
    %164 = tpu.matmul %100, %161, %cst_80 {dimension_numbers = #tpu.dot_dimension_numbers<[1], [0], [0], [1], [0, 0, 1, 1], [], []>} : vector<25x24xf32>, vector<24x128xf32>, vector<25x128xf32> -> vector<25x128xf32>
    %165 = arith.addf %163, %164 : vector<25x128xf32>
    %cst_81 = arith.constant dense<0.000000e+00> : vector<25x128xf32>
    %166 = tpu.matmul %102, %162, %cst_81 {dimension_numbers = #tpu.dot_dimension_numbers<[1], [0], [0], [1], [0, 0, 1, 1], [], []>} : vector<25x24xf32>, vector<24x128xf32>, vector<25x128xf32> -> vector<25x128xf32>
    %167 = arith.addf %165, %166 : vector<25x128xf32>
    %c1_82 = arith.constant 1 : index
    %c1_83 = arith.constant 1 : index
    %c0_84 = arith.constant 0 : index
    %168 = arith.index_cast %3 : i32 to index
    %169 = vector.load %arg3[%c1_82, %c1_83, %c0_84, %168] : memref<2x3x25x128xf32, #tpu.memory_space<vmem>>, vector<1x1x25x128xf32>
    %170 = vector.shape_cast %169 : vector<1x1x25x128xf32> to vector<25x128xf32>
    %171 = vector.shape_cast %167 : vector<25x128xf32> to vector<1x1x25x128xf32>
    tpu.vector_store %arg3[%c1_82, %c1_83, %c0_84, %168], %171 {strides = array<i32>} : memref<2x3x25x128xf32, #tpu.memory_space<vmem>>, vector<1x1x25x128xf32>,
    %172 = arith.mulf %121, %162 : vector<24x128xf32>
    %173 = arith.mulf %122, %161 : vector<24x128xf32>
    %174 = arith.subf %172, %173 : vector<24x128xf32>
    %175 = arith.mulf %122, %160 : vector<24x128xf32>
    %176 = arith.mulf %120, %162 : vector<24x128xf32>
    %177 = arith.subf %175, %176 : vector<24x128xf32>
    %178 = arith.mulf %120, %161 : vector<24x128xf32>
    %179 = arith.mulf %121, %160 : vector<24x128xf32>
    %180 = arith.subf %178, %179 : vector<24x128xf32>
    %cst_85 = arith.constant dense<0.000000e+00> : vector<25x128xf32>
    %181 = tpu.matmul %98, %174, %cst_85 {dimension_numbers = #tpu.dot_dimension_numbers<[1], [0], [0], [1], [0, 0, 1, 1], [], []>} : vector<25x24xf32>, vector<24x128xf32>, vector<25x128xf32> -> vector<25x128xf32>
    %cst_86 = arith.constant dense<0.000000e+00> : vector<25x128xf32>
    %182 = tpu.matmul %100, %177, %cst_86 {dimension_numbers = #tpu.dot_dimension_numbers<[1], [0], [0], [1], [0, 0, 1, 1], [], []>} : vector<25x24xf32>, vector<24x128xf32>, vector<25x128xf32> -> vector<25x128xf32>
    %183 = arith.addf %181, %182 : vector<25x128xf32>
    %cst_87 = arith.constant dense<0.000000e+00> : vector<25x128xf32>
    %184 = tpu.matmul %102, %180, %cst_87 {dimension_numbers = #tpu.dot_dimension_numbers<[1], [0], [0], [1], [0, 0, 1, 1], [], []>} : vector<25x24xf32>, vector<24x128xf32>, vector<25x128xf32> -> vector<25x128xf32>
    %185 = arith.addf %183, %184 : vector<25x128xf32>
    %c1_88 = arith.constant 1 : index
    %c2_89 = arith.constant 2 : index
    %c0_90 = arith.constant 0 : index
    %186 = arith.index_cast %3 : i32 to index
    %187 = vector.load %arg3[%c1_88, %c2_89, %c0_90, %186] : memref<2x3x25x128xf32, #tpu.memory_space<vmem>>, vector<1x1x25x128xf32>
    %188 = vector.shape_cast %187 : vector<1x1x25x128xf32> to vector<25x128xf32>
    %189 = vector.shape_cast %185 : vector<25x128xf32> to vector<1x1x25x128xf32>
    tpu.vector_store %arg3[%c1_88, %c2_89, %c0_90, %186], %189 {strides = array<i32>} : memref<2x3x25x128xf32, #tpu.memory_space<vmem>>, vector<1x1x25x128xf32>,
    %c1_i32_91 = arith.constant 1 : i32
    return
  }
  func.func @transform_0(%arg0: i32) -> (i32, i32, i32, i32) {
    %c0_i32 = arith.constant 0 : i32
    %c0_i32_0 = arith.constant 0 : i32
    %c0_i32_1 = arith.constant 0 : i32
    %c0_i32_2 = arith.constant 0 : i32
    return %c0_i32, %c0_i32_0, %c0_i32_1, %arg0 : i32, i32, i32, i32
  }
  func.func @transform_1(%arg0: i32) -> (i32, i32, i32, i32) {
    %c0_i32 = arith.constant 0 : i32
    %c0_i32_0 = arith.constant 0 : i32
    %c0_i32_1 = arith.constant 0 : i32
    %c0_i32_2 = arith.constant 0 : i32
    %c0_i32_3 = arith.constant 0 : i32
    return %c0_i32, %c0_i32_0, %c0_i32_1, %c0_i32_2 : i32, i32, i32, i32
  }
  func.func @transform_2(%arg0: i32) -> (i32, i32, i32, i32) {
    %c0_i32 = arith.constant 0 : i32
    %c0_i32_0 = arith.constant 0 : i32
    %c0_i32_1 = arith.constant 0 : i32
    %c0_i32_2 = arith.constant 0 : i32
    return %c0_i32, %c0_i32_0, %c0_i32_1, %arg0 : i32, i32, i32, i32
  }
}

</mosaic_0001>

<bundles_post_ra>
// kernel: hand_maker_forward.1
= control target key start
LH: loop header
LB: loop body
LE: loop exit
PB: predicated region body
PF: predicated region fallthrough
CT: control target
= control target key end

     0   :  { %vm68_vm0 = vcmask 195584   ;;  %s3479_s0 = inlined_call_operand.vmem [shape: f32[2,6,24,128], index: 0, kind: input, shape index: {}]   ;;  %s3480_s1 = inlined_call_operand.vmem [shape: f32[2,3,25,24], index: 1, kind: input, shape index: {}]   ;;  %s3481_s2 = inlined_call_operand.vmem [shape: f32[2,3,25,128], index: 2, kind: output, shape index: {}]  }
   0x1   :  { %v2667_v0 = vld [vmem:[%s3479_s0] sm:$0xff]  ;;  %v2672_v1 = vld [vmem:[%s3479_s0 + $0x8] sm:$0xff]  ;;  %v2677_v2 = vld [vmem:[%s3479_s0 + $0x18] sm:$0xff] }
   0x2   :  { %v2682_v3 = vld [vmem:[%s3479_s0 + $0x20] sm:$0xff]  ;;  %v2029_v4 = vld [vmem:[%s3479_s0 + $0x30] sm:$0xff]  ;;  %v2690_v5 = vld [vmem:[%s3479_s0 + $0x38] sm:$0xff]  ;;  %v38_v6 = vmul.f32 %v2667_v0, %v2667_v0  ;;  %v39_v7 = vmul.f32 %v2672_v1, %v2672_v1  ;;  %v41_v8 = vmul.f32 %v2677_v2, %v2677_v2 }
   0x3   :  { %v42_v9 = vmul.f32 %v2682_v3, %v2682_v3  ;;  %v47_v10 = vmul.f32 %v2029_v4, %v2029_v4  ;;  %v48_v11 = vmul.f32 %v2690_v5, %v2690_v5  ;;  %v2705_v12 = vld [vmem:[%s3479_s0 + $0x10] sm:$0xff]  ;;  %v2710_v13 = vld [vmem:[%s3479_s0 + $0x28] sm:$0xff]  ;;  %v2715_v14 = vld [vmem:[%s3479_s0 + $0x40] sm:$0xff] }
   0x4   :  { %v44_v15 = vadd.f32 %v41_v8, %v38_v6  ;;  %v40_v16 = vmul.f32 %v2705_v12, %v2705_v12  ;;  %v43_v17 = vmul.f32 %v2710_v13, %v2710_v13  ;;  %v49_v18 = vmul.f32 %v2715_v14, %v2715_v14  ;;  %v2726_v19 = vld [vmem:[%s3480_s1 + $0x20] sm:$0xff]  ;;  %v2735_v28 = vld [vmem:[%s3479_s0 + $0x90] sm:$0xff]  ;;  %v2740_v29 = vld [vmem:[%s3479_s0 + $0x98] sm:$0xff] }
   0x5   :  { %v45_v20 = vadd.f32 %v42_v9, %v39_v7  ;;  %2295 = vmatprep.mubr.msk.f32.mxu0 %vm68_vm0, %v2726_v19  ;;  %2331 = vmatprep.mubr.msk.f32.mxu1 %vm68_vm0, %v2726_v19  ;;  %v2745_v30 = vld [vmem:[%s3479_s0 + $0xa8] sm:$0xff]  ;;  %v2750_v31 = vld [vmem:[%s3479_s0 + $0xb0] sm:$0xff]  ;;  %v2755_v32 = vld [vmem:[%s3479_s0 + $0xc0] sm:$0xff]  ;;  %v1033_v34 = vmul.f32 %v2735_v28, %v2735_v28  ;;  %v1034_v35 = vmul.f32 %v2740_v29, %v2740_v29 }
   0x6   :  { %v50_v21 = vadd.f32 %v47_v10, %v44_v15  ;;  %v46_v22 = vadd.f32 %v43_v17, %v40_v16  ;;  %v2760_v33 = vld [vmem:[%s3479_s0 + $0xc8] sm:$0xff]  ;;  %v1036_v36 = vmul.f32 %v2745_v30, %v2745_v30  ;;  %v1037_v37 = vmul.f32 %v2750_v31, %v2750_v31  ;;  %v2777_v40 = vld [vmem:[%s3479_s0 + $0xa0] sm:$0xff]  ;;  %v2782_v41 = vld [vmem:[%s3479_s0 + $0xb8] sm:$0xff] }
   0x7   :  { %v51_v23 = vadd.f32 %v48_v11, %v45_v20  ;;  %v1042_v38 = vmul.f32 %v2755_v32, %v2755_v32  ;;  %v1043_v39 = vmul.f32 %v2760_v33, %v2760_v33  ;;  %v2787_v42 = vld [vmem:[%s3479_s0 + $0xd0] sm:$0xff]  ;;  %v1035_v44 = vmul.f32 %v2777_v40, %v2777_v40  ;;  %v2044_v54 = vld [vmem:[%s3479_s0 + $0x48] sm:$0xff]  ;;  %v2047_v55 = vld [vmem:[%s3479_s0 + $0x60] sm:$0xff] }
   0x8   :  { %v53_v24 = vmax.f32 %v50_v21, 1e-24  ;;  %v52_v25 = vadd.f32 %v49_v18, %v46_v22  ;;  %v1039_v43 = vadd.f32 %v1036_v36, %v1033_v34  ;;  %v1038_v45 = vmul.f32 %v2782_v41, %v2782_v41  ;;  %v2045_v61 = vld [vmem:[%s3479_s0 + $0x50] sm:$0xff]  ;;  %v2051_v7 = vld [vmem:[%s3479_s0 + $0x80] sm:$0xff]  ;;  %v2046_v10 = vld [vmem:[%s3479_s0 + $0x58] sm:$0xff] }
   0x9   :  { %v54_v26 = vmax.f32 %v51_v23, 1e-24  ;;  %v1044_v46 = vmul.f32 %v2787_v42, %v2787_v42  ;;  %v1040_v47 = vadd.f32 %v1037_v37, %v1034_v35  ;;  %v2844_v11 = vld [vmem:[%s3479_s0 + $0x70] sm:$0xff]  ;;  %v2052_v20 = vld [vmem:[%s3479_s0 + $0x88] sm:$0xff] }
   0xa   :  { %2625 = vrsqrt.f32 %v53_v24  ;;  %v55_v27 = vmax.f32 %v52_v25, 1e-24  ;;  %v1045_v48 = vadd.f32 %v1042_v38, %v1039_v43  ;;  %v1041_v49 = vadd.f32 %v1038_v45, %v1035_v44 }
   0xb   :  { %2627 = vrsqrt.f32 %v54_v26  ;;  %v1046_v50 = vadd.f32 %v1043_v39, %v1040_v47  ;;  %v2876_v39 = vld [vmem:[%s3480_s1 + $0x30] sm:$0xff] }
   0xc   :  { %2629 = vrsqrt.f32 %v55_v27  ;;  %v1048_v51 = vmax.f32 %v1045_v48, 1e-24  ;;  %v1047_v52 = vadd.f32 %v1044_v46, %v1041_v49 }
   0xd   :  { %v1049_v56 = vmax.f32 %v1046_v50, 1e-24 }
   0xe   :  { %2631 = vrsqrt.f32 %v1048_v51 }
   0xf   :  { %2633 = vrsqrt.f32 %v1049_v56 }
  0x14   :  { %v2626_v53 = vpop.eup %2625 }
  0x15   :  { %v2628_v57 = vpop.eup %2627  ;;  %v2802_v58 = vmul.f32 %v2626_v53, %v2677_v2  ;;  %v2805_v59 = vmul.f32 %v2626_v53, %v2667_v0  ;;  %v2807_v60 = vmul.f32 %v2626_v53, %v2029_v4  ;;  %v2048_v0 = vld [vmem:[%s3479_s0 + $0x68] sm:$0xff]  ;;  %v2050_v4 = vld [vmem:[%s3479_s0 + $0x78] sm:$0xff] }
  0x16   :  { %v2630_v62 = vpop.eup %2629  ;;  %v2813_v63 = vmul.f32 %v2628_v57, %v2682_v3  ;;  %v2816_v6 = vmul.f32 %v2628_v57, %v2672_v1  ;;  %v2819_v2 = vmul.f32 %v2628_v57, %v2690_v5  ;;  %v1050_v3 = vmax.f32 %v1047_v52, 1e-24  ;;  %v2898_v53 = vld [vmem:[%s3480_s1 + $0x38] sm:$0x1] }
  0x17   :  { %v2831_v8 = vmul.f32 %v2630_v62, %v2710_v13  ;;  %v2834_v1 = vmul.f32 %v2630_v62, %v2705_v12  ;;  %v383_v5 = vmul.f32 %v2044_v54, %v2805_v59  ;;  %v386_v9 = vmul.f32 %v2047_v55, %v2802_v58 }
  0x18   :  { %v2505_v13 = vpack.c.bf16 %v2813_v63, %v2802_v58  ;;  %v384_v15 = vmul.f32 %v2045_v61, %v2816_v6  ;;  %v387_v12 = vmul.f32 %v2048_v0, %v2813_v63  ;;  %v392_v17 = vmul.f32 %v2050_v4, %v2807_v60  ;;  %v2632_v45 = vpop.eup %2631 }
  0x19   :  { %v389_v16 = vadd.f32 %v386_v9, %v383_v5  ;;  %v393_v18 = vmul.f32 %v2051_v7, %v2819_v2  ;;  %v2856_v21 = vmul.f32 %v2630_v62, %v2715_v14  ;;  %v385_v22 = vmul.f32 %v2046_v10, %v2834_v1  ;;  %v2868_v14 = vld [vmem:[%s3480_s1 + $0x28] sm:$0xff]  ;;  %v2634_v57 = vpop.eup %2633  ;;  %v2910_v62 = vld [vmem:[%s3480_s1] sm:$0xff] }
  0x1a   :  { %2506 = vmatprep.subr.bf16.mxu0 %v2505_v13  ;;  %v388_v23 = vmul.f32 %v2844_v11, %v2831_v8  ;;  %v390_v24 = vadd.f32 %v387_v12, %v384_v15  ;;  %2635 = vrsqrt.f32 %v1050_v3  ;;  %v2509_v26 = vpack.c.bf16 %v2816_v6, %v2805_v59 }
  0x1b   :  { %2508 = vmatpush3.bf16.msra.mxu0 %v2505_v13  ;;  %v395_v25 = vadd.f32 %v392_v17, %v389_v16  ;;  %v394_v34 = vmul.f32 %v2052_v20, %v2856_v21  ;;  %v2513_v43 = vpack.c.bf16 %v2819_v2, %v2807_v60  ;;  %v2933_v16 = vmul.f32 %v2632_v45, %v2745_v30 }
  0x1c   :  { %2293 = vmatprep.subr.mxu0 %v2831_v8  ;;  %v391_v27 = vadd.f32 %v388_v23, %v385_v22  ;;  %v396_v35 = vadd.f32 %v393_v18, %v390_v24  ;;  %v2941_v18 = vld [vmem:[%s3480_s1 + $0x8] sm:$0xff] }
  0x1d   :  { %v398_v36 = vmul.f32 %v395_v25, %v2805_v59  ;;  %v404_v37 = vmul.f32 %v395_v25, %v2802_v58  ;;  %v410_v38 = vmul.f32 %v395_v25, %v2807_v60  ;;  %v2951_v25 = vld [vmem:[%s3480_s1 + $0x10] sm:$0xff] }
  0x1e   :  { %v397_v44 = vadd.f32 %v394_v34, %v391_v27  ;;  %v399_v46 = vmul.f32 %v396_v35, %v2816_v6  ;;  %v405_v48 = vmul.f32 %v396_v35, %v2813_v63  ;;  %v411_v50 = vmul.f32 %v396_v35, %v2819_v2 }
  0x1f   :  { %2294 = vmatpush3.msra.mxu0 %v2831_v8  ;;  %v2882_v47 = vsub.f32 %v2044_v54, %v398_v36  ;;  %v2885_v49 = vsub.f32 %v2047_v55, %v404_v37  ;;  %v2890_v51 = vsub.f32 %v2050_v4, %v410_v38  ;;  %v2957_v27 = vmul.f32 %v2632_v45, %v2755_v32  ;;  %v2974_v32 = vld [vmem:[%s3479_s0 + $0xf8] sm:$0xff]  ;;  %v2128_v36 = vld [vmem:[%s3479_s0 + $0x108] sm:$0xff] }
  0x20   :  { %2296 = vmatmul.mubr.msk.f32.vlgmr.msra.gmra.mrb[0].mxu0 %vm68_vm0, %v2868_v14  ;;  %2510 = vmatprep.subr.bf16.mxu0 %v2509_v26  ;;  %v400_v52 = vmul.f32 %v397_v44, %v2834_v1  ;;  %v2900_v54 = vsub.f32 %v2045_v61, %v399_v46  ;;  %v2902_v55 = vsub.f32 %v2048_v0, %v405_v48  ;;  %v2123_v48 = vld [vmem:[%s3479_s0 + $0xe0] sm:$0xff] }
  0x21   :  { %2298 = vmatprep.mubr.msk.f32.mxu0 %vm68_vm0, %v2876_v39  ;;  %2512 = vmatpush3.bf16.msra.mxu0 %v2509_v26  ;;  %v416_v56 = vmul.f32 %v2882_v47, %v2882_v47  ;;  %v2912_v4 = vsub.f32 %v2051_v7, %v411_v50  ;;  %v419_v3 = vmul.f32 %v2885_v49, %v2885_v49 }
  0x22   :  { %2305 = vmatprep.subr.mxu0 %v2834_v1  ;;  %v425_v61 = vmul.f32 %v2890_v51, %v2890_v51  ;;  %v2918_v0 = vsub.f32 %v2046_v10, %v400_v52  ;;  %v417_v5 = vmul.f32 %v2900_v54, %v2900_v54  ;;  %v420_v9 = vmul.f32 %v2902_v55, %v2902_v55 }
  0x23   :  { %v406_v13 = vmul.f32 %v397_v44, %v2831_v8  ;;  %v412_v15 = vmul.f32 %v397_v44, %v2856_v21  ;;  %v422_v7 = vadd.f32 %v419_v3, %v416_v56  ;;  %v426_v12 = vmul.f32 %v2912_v4, %v2912_v4  ;;  %3486 = vst [vmem:[#allocation2_spill] sm:$0xff] %v2957_v27 }
  0x24   :  { %2299 = vmatmul.mubr.msk.f32.gmra.mrb[2].mxu0 %vm68_vm0, %v2898_v53  ;;  %v418_v10 = vmul.f32 %v2918_v0, %v2918_v0  ;;  %v2636_v17 = vpop.eup %2635  ;;  %v423_v22 = vadd.f32 %v420_v9, %v417_v5  ;;  %v2954_v26 = vmul.f32 %v2634_v57, %v2750_v31  ;;  %v2122_v31 = vld [vmem:[%s3479_s0 + $0xd8] sm:$0xff]  ;;  %v2982_v38 = vmul.f32 %v2634_v57, %v2760_v33 }
  0x25   :  { %2306 = vmatpush3.msra.mxu0 %v2834_v1  ;;  %2307 = vmatprep.mubr.msk.f32.mxu0 %vm68_vm0, %v2910_v62  ;;  %v2944_v23 = vsub.f32 %v2844_v11, %v406_v13  ;;  %v2946_v24 = vsub.f32 %v2052_v20, %v412_v15  ;;  %v428_v30 = vadd.f32 %v425_v61, %v422_v7  ;;  %v2962_v11 = vld [vmem:[%s3479_s0 + $0xf0] sm:$0xff]  ;;  %v2998_v33 = vld [vmem:[%s3480_s1 + $0x18] sm:$0x1]  ;;  %v3030_v13 = vld [vmem:[%s3479_s0 + $0xe8] sm:$0xff] }
  0x26   :  { %2514 = vmatprep.subr.bf16.mxu0 %v2513_v43  ;;  %v429_v20 = vadd.f32 %v426_v12, %v423_v22  ;;  %3487 = vst [vmem:[#allocation3_spill] sm:$0xff] %v2982_v38  ;;  %v2985_v44 = vmul.f32 %v2636_v17, %v2782_v41  ;;  %v2988_v46 = vmul.f32 %v2632_v45, %v2735_v28  ;;  %v2129_v28 = vld [vmem:[%s3479_s0 + $0x110] sm:$0xff] }
  0x27   :  { %v421_v34 = vmul.f32 %v2944_v23, %v2944_v23  ;;  %v427_v35 = vmul.f32 %v2946_v24, %v2946_v24  ;;  %v431_v37 = vmax.f32 %v428_v30, 1e-24  ;;  %v3001_v41 = vmul.f32 %v2634_v57, %v2740_v29  ;;  %v3017_v29 = vld [vmem:[%s3480_s1 + $0x40] sm:$0xff]  ;;  %v3051_v30 = vld [vmem:[%s3480_s1 + $0x48] sm:$0xff] }
  0x28   :  { %2308 = vmatmul.mubr.msk.f32.vlgmr.msra.gmra.mrb[0].mxu0 %vm68_vm0, %v2941_v18  ;;  %v432_v50 = vmax.f32 %v429_v20, 1e-24  ;;  %v1381_v45 = vmul.f32 %v2962_v11, %v2933_v16  ;;  %v1378_v56 = vmul.f32 %v2122_v31, %v2988_v46  ;;  %v1382_v57 = vmul.f32 %v2974_v32, %v2954_v26 }
  0x29   :  { %2310 = vmatprep.mubr.msk.f32.mxu0 %vm68_vm0, %v2951_v25  ;;  %2516 = vmatpush3.bf16.msra.mxu0 %v2513_v43  ;;  %v424_v52 = vadd.f32 %v421_v34, %v418_v10  ;;  %v3011_v43 = vld [vmem:[%s3479_s0 + $0x100] sm:$0xff]  ;;  %2637 = vrsqrt.f32 %v431_v37  ;;  %v1387_v3 = vmul.f32 %v2128_v36, %v2957_v27  ;;  %v3024_v5 = vmul.f32 %v2636_v17, %v2787_v42  ;;  %v3041_v42 = vld [vmem:[%s3479_s0 + $0x118] sm:$0xff] }
  0x2a   :  { %2317 = vmatprep.subr.mxu0 %v2856_v21  ;;  %2639 = vrsqrt.f32 %v432_v50  ;;  %v1379_v9 = vmul.f32 %v2123_v48, %v3001_v41  ;;  %v1384_v15 = vadd.f32 %v1381_v45, %v1378_v56  ;;  %v1388_v7 = vmul.f32 %v2129_v28, %v2982_v38 }
  0x2b   :  { %v430_v61 = vadd.f32 %v427_v35, %v424_v52  ;;  %v3036_v12 = vmul.f32 %v2636_v17, %v2777_v40  ;;  %v1383_v10 = vmul.f32 %v3011_v43, %v2985_v44  ;;  %v3056_v17 = vld [vmem:[%s3480_s1 + $0x50] sm:$0xff]  ;;  %v1389_v37 = vmul.f32 %v3041_v42, %v3024_v5 }
  0x2c   :  { %2311 = vmatmul.mubr.msk.f32.gmra.mrb[2].mxu0 %vm68_vm0, %v2998_v33  ;;  %v1385_v40 = vadd.f32 %v1382_v57, %v1379_v9  ;;  %v1390_v20 = vadd.f32 %v1387_v3, %v1384_v15  ;;  %v3072_v57 = vld [vmem:[%s3480_s1 + $0x58] sm:$0x1] }
  0x2d   :  { %v433_v22 = vmax.f32 %v430_v61, 1e-24  ;;  %2318 = vmatpush3.msra.mxu0 %v2856_v21  ;;  %2319 = vmatprep.mubr.msk.f32.mxu0 %vm68_vm0, %v3017_v29  ;;  %v1380_v34 = vmul.f32 %v3030_v13, %v3036_v12 }
  0x2e   :  { %v1391_v35 = vadd.f32 %v1388_v7, %v1385_v40  ;;  %v1393_v50 = vmul.f32 %v1390_v20, %v2988_v46  ;;  %v1399_v52 = vmul.f32 %v1390_v20, %v2933_v16  ;;  %v1405_v45 = vmul.f32 %v1390_v20, %v2957_v27 }
  0x2f   :  { %2641 = vrsqrt.f32 %v433_v22  ;;  %v1386_v56 = vadd.f32 %v1383_v10, %v1380_v34 }
  0x30   :  { %2320 = vmatmul.mubr.msk.f32.vlgmr.msra.gmra.mrb[0].mxu0 %vm68_vm0, %v3051_v30  ;;  %v1394_v3 = vmul.f32 %v1391_v35, %v3001_v41  ;;  %v1400_v61 = vmul.f32 %v1391_v35, %v2954_v26  ;;  %v1406_v9 = vmul.f32 %v1391_v35, %v2982_v38  ;;  %v3077_v15 = vsub.f32 %v2122_v31, %v1393_v50 }
  0x31   :  { %2322 = vmatprep.mubr.msk.f32.mxu0 %vm68_vm0, %v3056_v17  ;;  %v3084_v22 = vsub.f32 %v2962_v11, %v1399_v52  ;;  %v3086_v40 = vsub.f32 %v2128_v36, %v1405_v45  ;;  %v3088_v20 = vadd.f32 %v1389_v37, %v1386_v56 }
  0x32   :  { %v3081_v10 = vsub.f32 %v2123_v48, %v1394_v3  ;;  %v3096_v48 = vsub.f32 %v2974_v32, %v1400_v61  ;;  %v3101_v50 = vsub.f32 %v2129_v28, %v1406_v9 }
  0x33   :  { %v2638_v7 = vpop.eup %2637  ;;  %v1414_v3 = vmul.f32 %v3084_v22, %v3084_v22 }
  0x34   :  { %2323 = vmatmul.mubr.msk.f32.gmra.mrb[2].mxu0 %vm68_vm0, %v3072_v57  ;;  %v2640_v34 = vpop.eup %2639  ;;  %v440_v27 = vmul.f32 %v2638_v7, %v2885_v49  ;;  %v437_v35 = vmul.f32 %v2638_v7, %v2882_v47  ;;  %v443_v31 = vmul.f32 %v2638_v7, %v2890_v51 }
  0x35   :  { %2367 = vmatprep.mubr.msk.f32.mxu0 %vm68_vm0, %v2726_v19  ;;  %v441_v11 = vmul.f32 %v2640_v34, %v2902_v55  ;;  %v438_v36 = vmul.f32 %v2640_v34, %v2900_v54  ;;  %v444_v37 = vmul.f32 %v2640_v34, %v2912_v4  ;;  %v1411_v54 = vmul.f32 %v3077_v15, %v3077_v15 }
  0x36   :  { %v720_v49 = vmul.f32 %v437_v35, %v2807_v60  ;;  %v723_v47 = vmul.f32 %v443_v31, %v2805_v59  ;;  %v711_v51 = vmul.f32 %v443_v31, %v2802_v58  ;;  %v714_v52 = vmul.f32 %v440_v27, %v2807_v60 }
  0x37   :  { %v2517_v19 = vpack.c.bf16 %v441_v11, %v440_v27  ;;  %v721_v32 = vmul.f32 %v438_v36, %v2819_v2  ;;  %v724_v45 = vmul.f32 %v444_v37, %v2816_v6  ;;  %v712_v28 = vmul.f32 %v444_v37, %v2813_v63 }
  0x38   :  { %v726_v4 = vsub.f32 %v720_v49, %v723_v47  ;;  %v715_v56 = vmul.f32 %v441_v11, %v2819_v2  ;;  %v717_v34 = vsub.f32 %v711_v51, %v714_v52  ;;  %v1412_v2 = vmul.f32 %v3081_v10, %v3081_v10 }
  0x39   :  { %v2642_v55 = vpop.eup %2641  ;;  %2518 = vmatprep.subr.bf16.mxu1 %v2517_v19  ;;  %v727_v61 = vsub.f32 %v721_v32, %v724_v45  ;;  %v1415_v47 = vmul.f32 %v3096_v48, %v3096_v48  ;;  %v2525_v32 = vpack.c.bf16 %v444_v37, %v443_v31  ;;  %v1420_v51 = vmul.f32 %v3086_v40, %v3086_v40 }
  0x3a   :  { %v3116_v60 = vmul.f32 %v2642_v55, %v2944_v23  ;;  %v3119_v9 = vmul.f32 %v2642_v55, %v2918_v0  ;;  %v3122_v7 = vmul.f32 %v2642_v55, %v2946_v24  ;;  %2520 = vmatpush3.bf16.msra.mxu1 %v2517_v19  ;;  %v718_v49 = vsub.f32 %v712_v28, %v715_v56 }
  0x3b   :  { %v2521_v23 = vpack.c.bf16 %v438_v36, %v437_v35  ;;  %v2529_v38 = vpack.c.bf16 %v727_v61, %v726_v4  ;;  %v1395_v52 = vmul.f32 %v3088_v20, %v3036_v12  ;;  %v729_v45 = vmul.f32 %v440_v27, %v2805_v59 }
  0x3c   :  { %2329 = vmatprep.subr.mxu1 %v3116_v60  ;;  %v722_v0 = vmul.f32 %v3119_v9, %v2856_v21  ;;  %v725_v24 = vmul.f32 %v3122_v7, %v2834_v1  ;;  %v730_v55 = vmul.f32 %v441_v11, %v2816_v6  ;;  %v1417_v4 = vadd.f32 %v1414_v3, %v1411_v54 }
  0x3d   :  { %2530 = vmatprep.subr.bf16.mxu0 %v2529_v38  ;;  %v2533_v28 = vpack.c.bf16 %v718_v49, %v717_v34  ;;  %v713_v31 = vmul.f32 %v3122_v7, %v2831_v8  ;;  %v716_v37 = vmul.f32 %v3116_v60, %v2856_v21  ;;  %v732_v56 = vmul.f32 %v437_v35, %v2802_v58 }
  0x3e   :  { %v728_v19 = vsub.f32 %v722_v0, %v725_v24  ;;  %2330 = vmatpush3.msra.mxu1 %v3116_v60  ;;  %2532 = vmatpush3.bf16.msra.mxu0 %v2529_v38  ;;  %v1418_v59 = vadd.f32 %v1415_v47, %v1412_v2  ;;  %v1421_v6 = vmul.f32 %v3101_v50, %v3101_v50 }
  0x3f   :  { %2332 = vmatmul.mubr.msk.f32.vlgmr.msra.gmra.mrb[0].mxu1 %vm68_vm0, %v2868_v14  ;;  %2522 = vmatprep.subr.bf16.mxu1 %v2521_v23  ;;  %v733_v27 = vmul.f32 %v438_v36, %v2813_v63  ;;  %v1423_v38 = vadd.f32 %v1420_v51, %v1417_v4  ;;  %v3153_v11 = vsub.f32 %v3030_v13, %v1395_v52  ;;  %v3305_v4 = vld [vmem:[%s3480_s1 + $0x70] sm:$0xff] }
  0x40   :  { %2524 = vmatpush3.bf16.msra.mxu1 %v2521_v23  ;;  %2334 = vmatprep.mubr.msk.f32.mxu1 %vm68_vm0, %v2876_v39  ;;  %v1424_v21 = vadd.f32 %v1421_v6, %v1418_v59  ;;  %v1401_v58 = vmul.f32 %v3088_v20, %v2985_v44  ;;  %v1407_v35 = vmul.f32 %v3088_v20, %v3024_v5  ;;  %v3321_v6 = vld [vmem:[%s3480_s1 + $0x78] sm:$0x1] }
  0x41   :  { %2341 = vmatprep.subr.mxu1 %v3119_v9  ;;  %2365 = vmatprep.subr.mxu0 %v728_v19  ;;  %v1426_v54 = vmax.f32 %v1423_v38, 1e-24  ;;  %v1413_v3 = vmul.f32 %v3153_v11, %v3153_v11  ;;  %v719_v20 = vsub.f32 %v713_v31, %v716_v37  ;;  %v735_v61 = vsub.f32 %v729_v45, %v732_v56 }
  0x42   :  { %2366 = vmatpush3.msra.mxu0 %v728_v19  ;;  %v1427_v63 = vmax.f32 %v1424_v21, 1e-24  ;;  %v3165_v13 = vsub.f32 %v3011_v43, %v1401_v58  ;;  %v3168_v36 = vsub.f32 %v3041_v42, %v1407_v35  ;;  %v2541_v49 = vpack.c.bf16 %v2954_v26, %v2933_v16  ;;  %v3334_v21 = vld [vmem:[%s3480_s1 + $0xa0] sm:$0xff] }
  0x43   :  { %2335 = vmatmul.mubr.msk.f32.gmra.mrb[2].mxu1 %vm68_vm0, %v2898_v53  ;;  %2368 = vmatmul.mubr.msk.f32.vlgmr.msra.gmra.mrb[4].mxu0 %vm68_vm0, %v2868_v14  ;;  %2643 = vrsqrt.f32 %v1426_v54  ;;  %v736_v14 = vsub.f32 %v730_v55, %v733_v27  ;;  %v731_v2 = vmul.f32 %v3116_v60, %v2834_v1  ;;  %v734_v47 = vmul.f32 %v3119_v9, %v2831_v8  ;;  %v3298_v55 = vld [vmem:[%s3480_s1 + $0x68] sm:$0xff] }
  0x44   :  { %2342 = vmatpush3.msra.mxu1 %v3119_v9  ;;  %2343 = vmatprep.mubr.msk.f32.mxu1 %vm68_vm0, %v2910_v62  ;;  %2645 = vrsqrt.f32 %v1427_v63  ;;  %v1416_v43 = vmul.f32 %v3165_v13, %v3165_v13  ;;  %v1422_v42 = vmul.f32 %v3168_v36, %v3168_v36 }
  0x45   :  { %2526 = vmatprep.subr.bf16.mxu1 %v2525_v32  ;;  %2534 = vmatprep.subr.bf16.mxu0 %v2533_v28  ;;  %v737_v8 = vsub.f32 %v731_v2, %v734_v47 }
  0x46   :  { %2370 = vmatprep.mubr.msk.f32.mxu0 %vm68_vm0, %v2876_v39  ;;  %2536 = vmatpush3.bf16.msra.mxu0 %v2533_v28  ;;  %v1419_v34 = vadd.f32 %v1416_v43, %v1413_v3  ;;  %v2537_v39 = vpack.c.bf16 %v736_v14, %v735_v61  ;;  %v2096_v43 = vld [vmem:[%s3480_s1 + $0xb8] sm:$0x1] }
  0x47   :  { %2344 = vmatmul.mubr.msk.f32.vlgmr.msra.gmra.mrb[0].mxu1 %vm68_vm0, %v2941_v18  ;;  %2371 = vmatmul.mubr.msk.f32.gmra.mrb[6].mxu0 %vm68_vm0, %v2898_v53 }
  0x48   :  { %2528 = vmatpush3.bf16.msra.mxu1 %v2525_v32  ;;  %2346 = vmatprep.mubr.msk.f32.mxu1 %vm68_vm0, %v2951_v25  ;;  %v1425_v23 = vadd.f32 %v1422_v42, %v1419_v34 }
  0x49   :  { %2353 = vmatprep.subr.mxu1 %v3122_v7  ;;  %2377 = vmatprep.subr.mxu0 %v719_v20 }
  0x4a   :  { %2378 = vmatpush3.msra.mxu0 %v719_v20  ;;  %2379 = vmatprep.mubr.msk.f32.mxu0 %vm68_vm0, %v2910_v62  ;;  %v1428_v53 = vmax.f32 %v1425_v23, 1e-24 }
  0x4b   :  { %2347 = vmatmul.mubr.msk.f32.gmra.mrb[2].mxu1 %vm68_vm0, %v2998_v33  ;;  %2380 = vmatmul.mubr.msk.f32.vlgmr.msra.gmra.mrb[4].mxu0 %vm68_vm0, %v2941_v18 }
  0x4c   :  { %2354 = vmatpush3.msra.mxu1 %v3122_v7  ;;  %2355 = vmatprep.mubr.msk.f32.mxu1 %vm68_vm0, %v3017_v29  ;;  %2647 = vrsqrt.f32 %v1428_v53 }
  0x4d   :  { %2542 = vmatprep.subr.bf16.mxu1 %v2541_v49  ;;  %2538 = vmatprep.subr.bf16.mxu0 %v2537_v39  ;;  %v2644_v1 = vpop.eup %2643 }
  0x4e   :  { %2382 = vmatprep.mubr.msk.f32.mxu0 %vm68_vm0, %v2951_v25  ;;  %2540 = vmatpush3.bf16.msra.mxu0 %v2537_v39  ;;  %v2646_v62 = vpop.eup %2645  ;;  %v3210_v18 = vmul.f32 %v2644_v1, %v3084_v22  ;;  %v3221_v25 = vld [vmem:[%s3480_s1 + $0x80] sm:$0xff]  ;;  %v1438_v9 = vmul.f32 %v2644_v1, %v3086_v40  ;;  %v3251_v7 = vmul.f32 %v2644_v1, %v3077_v15  ;;  %v3489_v40 = vld [vmem:[#allocation3_spill] sm:$0xff] }
  0x4f   :  { %2356 = vmatmul.mubr.msk.f32.vlgmr.msra.gmra.mrb[0].mxu1 %vm68_vm0, %v3051_v30  ;;  %2383 = vmatmul.mubr.msk.f32.gmra.mrb[6].mxu0 %vm68_vm0, %v2998_v33  ;;  %v3215_v60 = vmul.f32 %v2646_v62, %v3096_v48  ;;  %v2545_v33 = vpack.c.bf16 %v3001_v41, %v2988_v46  ;;  %v3239_v48 = vld [vmem:[%s3480_s1 + $0x88] sm:$0xff]  ;;  %v3254_v0 = vmul.f32 %v2646_v62, %v3081_v10  ;;  %v3488_v10 = vld [vmem:[#allocation2_spill] sm:$0xff] }
  0x50   :  { %2544 = vmatpush3.bf16.msra.mxu1 %v2541_v49  ;;  %2358 = vmatprep.mubr.msk.f32.mxu1 %vm68_vm0, %v3056_v17  ;;  %v1715_v32 = vmul.f32 %v3251_v7, %v3488_v10  ;;  %v1718_v52 = vmul.f32 %v1438_v9, %v2988_v46  ;;  %v1706_v59 = vmul.f32 %v1438_v9, %v2933_v16 }
  0x51   :  { %2401 = vmatprep.subr.mxu1 %v2985_v44  ;;  %2389 = vmatprep.subr.mxu0 %v737_v8  ;;  %v2553_v22 = vpack.c.bf16 %v3215_v60, %v3210_v18  ;;  %v1716_v51 = vmul.f32 %v3254_v0, %v3489_v40  ;;  %v2557_v45 = vpack.c.bf16 %v3254_v0, %v3251_v7 }
  0x52   :  { %2390 = vmatpush3.msra.mxu0 %v737_v8  ;;  %2391 = vmatprep.mubr.msk.f32.mxu0 %vm68_vm0, %v3017_v29  ;;  %v3244_v29 = vld [vmem:[%s3480_s1 + $0x90] sm:$0xff]  ;;  %v1721_v28 = vsub.f32 %v1715_v32, %v1718_v52  ;;  %v1709_v38 = vmul.f32 %v3210_v18, %v3488_v10  ;;  %v1724_v14 = vmul.f32 %v3210_v18, %v2988_v46 }
  0x53   :  { %2359 = vmatmul.mubr.msk.f32.gmra.mrb[2].mxu1 %vm68_vm0, %v3072_v57  ;;  %2392 = vmatmul.mubr.msk.f32.vlgmr.msra.gmra.mrb[4].mxu0 %vm68_vm0, %v3051_v30  ;;  %v1439_v30 = vmul.f32 %v2646_v62, %v3101_v50  ;;  %v2549_v50 = vpack.c.bf16 %v3489_v40, %v3488_v10  ;;  %v1725_v42 = vmul.f32 %v3215_v60, %v3001_v41 }
  0x54   :  { %2402 = vmatpush3.msra.mxu1 %v2985_v44  ;;  %2403 = vmatprep.mubr.msk.f32.mxu1 %vm68_vm0, %v3221_v25  ;;  %v1712_v20 = vsub.f32 %v1706_v59, %v1709_v38  ;;  %v1727_v34 = vmul.f32 %v3251_v7, %v2933_v16  ;;  %v1728_v49 = vmul.f32 %v3254_v0, %v2954_v26 }
  0x55   :  { %2546 = vmatprep.subr.bf16.mxu1 %v2545_v33  ;;  %2554 = vmatprep.subr.bf16.mxu0 %v2553_v22  ;;  %v1719_v19 = vmul.f32 %v1439_v30, %v3001_v41  ;;  %v1707_v27 = vmul.f32 %v1439_v30, %v2954_v26  ;;  %v2561_v63 = vpack.c.bf16 %v1439_v30, %v1438_v9 }
  0x56   :  { %2394 = vmatprep.mubr.msk.f32.mxu0 %vm68_vm0, %v3056_v17  ;;  %2556 = vmatpush3.bf16.msra.mxu0 %v2553_v22  ;;  %v2648_v24 = vpop.eup %2647  ;;  %v3265_v17 = vld [vmem:[%s3480_s1 + $0x98] sm:$0x1]  ;;  %v1730_v26 = vsub.f32 %v1724_v14, %v1727_v34  ;;  %v1731_v41 = vsub.f32 %v1725_v42, %v1728_v49 }
  0x57   :  { %2404 = vmatmul.mubr.msk.f32.vlgmr.msra.gmra.mrb[4].mxu1 %vm68_vm0, %v3239_v48  ;;  %2395 = vmatmul.mubr.msk.f32.gmra.mrb[6].mxu0 %vm68_vm0, %v3072_v57  ;;  %v3268_v15 = vmul.f32 %v2648_v24, %v3165_v13  ;;  %v3278_v57 = vld [vmem:[%s3480_s1 + $0x60] sm:$0xff]  ;;  %v1722_v31 = vsub.f32 %v1716_v51, %v1719_v19  ;;  %v1440_v37 = vmul.f32 %v2648_v24, %v3168_v36  ;;  %v2094_v13 = vld [vmem:[%s3480_s1 + $0xa8] sm:$0xff]  ;;  %v2095_v36 = vld [vmem:[%s3480_s1 + $0xb0] sm:$0xff] }
  0x58   :  { %2548 = vmatpush3.bf16.msra.mxu1 %v2545_v33  ;;  %2406 = vmatprep.mubr.msk.f32.mxu1 %vm68_vm0, %v3244_v29  ;;  %v3311_v56 = vmul.f32 %v2648_v24, %v3153_v11  ;;  %v1710_v11 = vmul.f32 %v3215_v60, %v3489_v40 }
  0x59   :  { %2413 = vmatprep.subr.mxu1 %v3036_v12  ;;  %2439 = vmatprep.mubr.msk.f32.mxu0 %vm68_vm0, %v3221_v25  ;;  %v2565_v58 = vpack.c.bf16 %v1722_v31, %v1721_v28  ;;  %v1720_v54 = vmul.f32 %v1440_v37, %v3036_v12  ;;  %v1708_v2 = vmul.f32 %v1440_v37, %v2985_v44 }
  0x5a   :  { %2437 = vmatprep.subr.mxu0 %v3268_v15  ;;  %v1717_v35 = vmul.f32 %v3311_v56, %v3024_v5  ;;  %v1713_v61 = vsub.f32 %v1707_v27, %v1710_v11  ;;  %v1711_v39 = vmul.f32 %v3268_v15, %v3024_v5  ;;  %v1726_v47 = vmul.f32 %v3268_v15, %v3036_v12 }
  0x5b   :  { %2407 = vmatmul.mubr.msk.f32.gmra.mrb[6].mxu1 %vm68_vm0, %v3265_v17  ;;  %2438 = vmatpush3.msra.mxu0 %v3268_v15  ;;  %v1729_v23 = vmul.f32 %v3311_v56, %v2985_v44 }
  0x5c   :  { %2414 = vmatpush3.msra.mxu1 %v3036_v12  ;;  %2415 = vmatprep.mubr.msk.f32.mxu1 %vm68_vm0, %v3278_v57  ;;  %v1723_v3 = vsub.f32 %v1717_v35, %v1720_v54  ;;  %v2569_v46 = vpack.c.bf16 %v1713_v61, %v1712_v20  ;;  %v1714_v16 = vsub.f32 %v1708_v2, %v1711_v39 }
  0x5d   :  { %2550 = vmatprep.subr.bf16.mxu1 %v2549_v50  ;;  %2440 = vmatmul.mubr.msk.f32.vlgmr.msra.gmra.mrb[8].mxu0 %vm68_vm0, %v3239_v48  ;;  %v1732_v53 = vsub.f32 %v1726_v47, %v1729_v23 }
  0x5e   :  { %2558 = vmatprep.subr.bf16.mxu0 %v2557_v45  ;;  %2442 = vmatprep.mubr.msk.f32.mxu0 %vm68_vm0, %v3244_v29 }
  0x5f   :  { %2416 = vmatmul.mubr.msk.f32.vlgmr.msra.gmra.mrb[4].mxu1 %vm68_vm0, %v3298_v55  ;;  %2560 = vmatpush3.bf16.msra.mxu0 %v2557_v45 }
  0x60   :  { %2552 = vmatpush3.bf16.msra.mxu1 %v2549_v50  ;;  %2418 = vmatprep.mubr.msk.f32.mxu1 %vm68_vm0, %v3305_v4 }
  0x61   :  { %2425 = vmatprep.subr.mxu1 %v3024_v5  ;;  %2443 = vmatmul.mubr.msk.f32.gmra.mrb[10].mxu0 %vm68_vm0, %v3265_v17 }
  0x62   :  { %2449 = vmatprep.subr.mxu0 %v3311_v56  ;;  %2451 = vmatprep.mubr.msk.f32.mxu0 %vm68_vm0, %v3278_v57 }
  0x63   :  { %2419 = vmatmul.mubr.msk.f32.gmra.mrb[6].mxu1 %vm68_vm0, %v3321_v6  ;;  %2450 = vmatpush3.msra.mxu0 %v3311_v56 }
  0x64   :  { %2426 = vmatpush3.msra.mxu1 %v3024_v5  ;;  %2427 = vmatprep.mubr.msk.f32.mxu1 %vm68_vm0, %v3334_v21  ;;  %v2573_v5 = vpack.c.bf16 %v1731_v41, %v1730_v26 }
  0x65   :  { %2452 = vmatmul.mubr.msk.f32.vlgmr.msra.gmra.mrb[8].mxu0 %vm68_vm0, %v3298_v55  ;;  %2566 = vmatprep.subr.bf16.mxu1 %v2565_v58 }
  0x66   :  { %2562 = vmatprep.subr.bf16.mxu0 %v2561_v63  ;;  %2454 = vmatprep.mubr.msk.f32.mxu0 %vm68_vm0, %v3305_v4 }
  0x67   :  { %2428 = vmatmul.mubr.msk.f32.vlgmr.msra.gmra.mrb[4].mxu1 %vm68_vm0, %v2094_v13  ;;  %2564 = vmatpush3.bf16.msra.mxu0 %v2561_v63 }
  0x68   :  { %2568 = vmatpush3.bf16.msra.mxu1 %v2565_v58  ;;  %2430 = vmatprep.mubr.msk.f32.mxu1 %vm68_vm0, %v2095_v36 }
  0x69   :  { %2455 = vmatmul.mubr.msk.f32.gmra.mrb[10].mxu0 %vm68_vm0, %v3321_v6  ;;  %2473 = vmatprep.subr.mxu1 %v1723_v3 }
  0x6a   :  { %2461 = vmatprep.subr.mxu0 %v1440_v37  ;;  %2463 = vmatprep.mubr.msk.f32.mxu0 %vm68_vm0, %v3334_v21 }
  0x6b   :  { %2431 = vmatmul.mubr.msk.f32.gmra.mrb[6].mxu1 %vm68_vm0, %v2096_v43  ;;  %2462 = vmatpush3.msra.mxu0 %v1440_v37 }
  0x6c   :  { %2474 = vmatpush3.msra.mxu1 %v1723_v3  ;;  %2475 = vmatprep.mubr.msk.f32.mxu1 %vm68_vm0, %v3221_v25 }
  0x6d   :  { %2464 = vmatmul.mubr.msk.f32.vlgmr.msra.gmra.mrb[8].mxu0 %vm68_vm0, %v2094_v13  ;;  %2570 = vmatprep.subr.bf16.mxu1 %v2569_v46 }
  0x6e   :  { %2466 = vmatprep.mubr.msk.f32.mxu0 %vm68_vm0, %v2095_v36 }
  0x6f   :  { %2476 = vmatmul.mubr.msk.f32.vlgmr.msra.gmra.mrb[8].mxu1 %vm68_vm0, %v3239_v48 }
  0x70   :  { %2572 = vmatpush3.bf16.msra.mxu1 %v2569_v46  ;;  %2478 = vmatprep.mubr.msk.f32.mxu1 %vm68_vm0, %v3244_v29 }
  0x71   :  { %2467 = vmatmul.mubr.msk.f32.gmra.mrb[10].mxu0 %vm68_vm0, %v2096_v43  ;;  %2485 = vmatprep.subr.mxu1 %v1714_v16 }
  0x73   :  { %2479 = vmatmul.mubr.msk.f32.gmra.mrb[10].mxu1 %vm68_vm0, %v3265_v17 }
  0x74   :  { %2486 = vmatpush3.msra.mxu1 %v1714_v16  ;;  %2487 = vmatprep.mubr.msk.f32.mxu1 %vm68_vm0, %v3278_v57 }
  0x75   :  { %2574 = vmatprep.subr.bf16.mxu1 %v2573_v5 }
  0x77   :  { %2488 = vmatmul.mubr.msk.f32.vlgmr.msra.gmra.mrb[8].mxu1 %vm68_vm0, %v3298_v55 }
  0x78   :  { %2576 = vmatpush3.bf16.msra.mxu1 %v2573_v5  ;;  %2490 = vmatprep.mubr.msk.f32.mxu1 %vm68_vm0, %v3305_v4 }
  0x79   :  { %2497 = vmatprep.subr.mxu1 %v1732_v53 }
  0x7b   :  { %2491 = vmatmul.mubr.msk.f32.gmra.mrb[10].mxu1 %vm68_vm0, %v3321_v6 }
  0x7c   :  { %2498 = vmatpush3.msra.mxu1 %v1732_v53  ;;  %2499 = vmatprep.mubr.msk.f32.mxu1 %vm68_vm0, %v3334_v21 }
  0x7f   :  { %2500 = vmatmul.mubr.msk.f32.vlgmr.msra.gmra.mrb[8].mxu1 %vm68_vm0, %v2094_v13 }
  0x80   :  { %2502 = vmatprep.mubr.msk.f32.mxu1 %vm68_vm0, %v2095_v36 }
  0x83   :  { %2503 = vmatmul.mubr.msk.f32.gmra.mrb[10].mxu1 %vm68_vm0, %v2096_v43 }
 0x103   :  { %v2321_v44 = vpop.f32.mrb[0].mxu0 }
 0x104   :  { %365 = vst [vmem:[%s3481_s2 + $0x8] sm:$0xff] %v2321_v44  ;;  %v341_v12 = vpop.f32.mrb[1].mxu0 }
 0x105   :  { %364 = vst [vmem:[%s3481_s2] sm:$0xff] %v341_v12 }
 0x107   :  { %v2324_v8 = vpop.f32.mrb[2].mxu0 }
 0x108   :  { %367 = vst [vmem:[%s3481_s2 + $0x18] sm:$0x1] %v2324_v8  ;;  %v351_v1 = vpop.f32.mrb[3].mxu0 }
 0x109   :  { %366 = vst [vmem:[%s3481_s2 + $0x10] sm:$0xff] %v351_v1 }
 0x122   :  { %v2357_v62 = vpop.f32.mrb[0].mxu1 }
 0x123   :  { %2066 = vst [vmem:[%s3481_s2 + $0x28] sm:$0xff] %v2357_v62  ;;  %v682_v18 = vpop.f32.mrb[1].mxu1 }
 0x124   :  { %2065 = vst [vmem:[%s3481_s2 + $0x20] sm:$0xff] %v682_v18 }
 0x126   :  { %v2360_v60 = vpop.f32.mrb[2].mxu1  ;;  %v2393_v25 = vpop.f32.mrb[4].mxu0 }
 0x127   :  { %2068 = vst [vmem:[%s3481_s2 + $0x38] sm:$0x1] %v2360_v60  ;;  %v692_v33 = vpop.f32.mrb[3].mxu1  ;;  %2082 = vst [vmem:[%s3481_s2 + $0x48] sm:$0xff] %v2393_v25  ;;  %v974_v22 = vpop.f32.mrb[5].mxu0 }
 0x128   :  { %2067 = vst [vmem:[%s3481_s2 + $0x30] sm:$0xff] %v692_v33  ;;  %2081 = vst [vmem:[%s3481_s2 + $0x40] sm:$0xff] %v974_v22 }
 0x12a   :  { %v2396_v48 = vpop.f32.mrb[6].mxu0 }
 0x12b   :  { %2084 = vst [vmem:[%s3481_s2 + $0x58] sm:$0x1] %v2396_v48  ;;  %v984_v29 = vpop.f32.mrb[7].mxu0 }
 0x12c   :  { %2083 = vst [vmem:[%s3481_s2 + $0x50] sm:$0xff] %v984_v29 }
 0x13a   :  { %v2429_v9 = vpop.f32.mrb[4].mxu1 }
 0x13b   :  { %2119 = vst [vmem:[%s3481_s2 + $0x68] sm:$0xff] %v2429_v9  ;;  %v1335_v30 = vpop.f32.mrb[5].mxu1 }
 0x13c   :  { %2118 = vst [vmem:[%s3481_s2 + $0x60] sm:$0xff] %v1335_v30 }
 0x13e   :  { %v2432_v7 = vpop.f32.mrb[6].mxu1 }
 0x13f   :  { %2121 = vst [vmem:[%s3481_s2 + $0x78] sm:$0x1] %v2432_v7  ;;  %v1345_v0 = vpop.f32.mrb[7].mxu1 }
 0x140   :  { %2120 = vst [vmem:[%s3481_s2 + $0x70] sm:$0xff] %v1345_v0  ;;  %v2465_v24 = vpop.f32.mrb[8].mxu0 }
 0x141   :  { %2144 = vst [vmem:[%s3481_s2 + $0x88] sm:$0xff] %v2465_v24  ;;  %v1677_v17 = vpop.f32.mrb[9].mxu0 }
 0x142   :  { %2143 = vst [vmem:[%s3481_s2 + $0x80] sm:$0xff] %v1677_v17 }
 0x144   :  { %v2468_v15 = vpop.f32.mrb[10].mxu0 }
 0x145   :  { %2146 = vst [vmem:[%s3481_s2 + $0x98] sm:$0x1] %v2468_v15  ;;  %v1687_v10 = vpop.f32.mrb[11].mxu0 }
 0x146   :  { %2145 = vst [vmem:[%s3481_s2 + $0x90] sm:$0xff] %v1687_v10 }
 0x152   :  { %v2501_v40 = vpop.f32.mrb[8].mxu1 }
 0x153   :  { %2160 = vst [vmem:[%s3481_s2 + $0xa8] sm:$0xff] %v2501_v40  ;;  %v1969_v50 = vpop.f32.mrb[9].mxu1 }
 0x154   :  { %2159 = vst [vmem:[%s3481_s2 + $0xa0] sm:$0xff] %v1969_v50 }
 0x156   :  { %v2504_v32 = vpop.f32.mrb[10].mxu1 }
 0x157   :  { %2162 = vst [vmem:[%s3481_s2 + $0xb8] sm:$0x1] %v2504_v32  ;;  %v1979_v57 = vpop.f32.mrb[11].mxu1 }
 0x158   :  { %2161 = vst [vmem:[%s3481_s2 + $0xb0] sm:$0xff] %v1979_v57 }

</bundles_post_ra>
